<compile_context>
chip_gen: v7x
topology: tpu7x:2x2x1
jax: 0.10.0
libtpu: 0.0.40
codegen_flags: <defaults>
</compile_context>

<pallas_src>
import functools

import jax
import jax.numpy as jnp
import numpy as np
from jax.experimental import pallas as pl
from jax.experimental.pallas import tpu as pltpu

LANE = 128
SUBLANE = 8


def mlp_kernel(x_ref, w1_ref, b1_ref, w2_ref, b2_ref, o_ref):
    # Cast activations/weights to bf16 for the MXU inside the kernel (the cast
    # is VPU work hidden under the x DMA); accumulate in f32.
    x_bf = x_ref[...].astype(jnp.bfloat16)           # (tb, 784)
    w1_bf = w1_ref[...].astype(jnp.bfloat16)          # (784, 128)
    h = jnp.dot(x_bf, w1_bf, preferred_element_type=jnp.float32)
    # Bias + ReLU in f32 on the VPU (b1 is a (1, 128) f32 row).
    h = jnp.maximum(h + b1_ref[...], 0.0)
    # fc2: bf16 operands, f32 accumulation; lane-dense (tb, 128) store.
    y = jnp.dot(h.astype(jnp.bfloat16), w2_ref[...].astype(jnp.bfloat16),
                preferred_element_type=jnp.float32)
    o_ref[...] = (y + b2_ref[...]).astype(o_ref.dtype)


def _round_up(x, m):
    return ((x + m - 1) // m) * m


def _device_defaults():
    """Per-generation (batch_tile, min_grid) defaults."""
    try:
        kind = jax.devices()[0].device_kind.lower()
    except Exception:
        kind = ""
    if "v7" in kind:
        # v7x: ~3.2 TB/s HBM -> bigger tiles, and keep the grid even so the
        # 'parallel' batch axis shards across both TensorCores.
        return 1024, 2
    # v5e / v6e (and fallback): 512-row tiles sit near HBM roofline already.
    return 512, 1


@functools.partial(jax.jit, static_argnames=("batch_tile", "min_grid"))
def _net_forward_impl(x_nchw, w1, b1, w2, b2, *, batch_tile, min_grid):
    B = x_nchw.shape[0]
    in_features, hidden = w1.shape          # (784, 128)
    out_size = w2.shape[1]

    # flatten(x, 1) -> (B, 784); stays f32 and UN-padded along K.
    x = x_nchw.reshape(B, -1).astype(jnp.float32)

    # --- Pad N (out_size -> 128) so the output store is lane-dense (tiny op).
    n_p = _round_up(out_size, LANE)
    w2_p = jnp.pad(w2, ((0, 0), (0, n_p - out_size)))
    b2_p = jnp.pad(b2, ((0, n_p - out_size),))

    # --- Batch tiling: balance tiles so the tail/pad waste is small, and only
    #     pad the batch when actually needed.
    n_tiles = max(1, -(-B // batch_tile))
    if min_grid > 1 and B >= min_grid * LANE:
        n_tiles = _round_up(n_tiles, min_grid)
    tb = _round_up(-(-B // n_tiles), SUBLANE)
    b_p = n_tiles * tb
    if b_p != B:
        x = jnp.pad(x, ((0, b_p - B), (0, 0)))

    # Biases as f32 (1, N) rows; weights stay f32 here (cast happens in-kernel).
    b1_2d = b1.reshape(1, hidden).astype(jnp.float32)
    b2_2d = b2_p.reshape(1, n_p).astype(jnp.float32)

    grid = (n_tiles,)
    out = pl.pallas_call(
        mlp_kernel,
        out_shape=jax.ShapeDtypeStruct((b_p, n_p), jnp.float32),
        grid=grid,
        in_specs=[
            # x tile per step; full-K (784) block equals the array dim.
            pl.BlockSpec((tb, in_features), lambda i: (i, 0)),
            # Weights / biases: constant block index -> stay VMEM-resident.
            pl.BlockSpec((in_features, hidden), lambda i: (0, 0)),   # W1
            pl.BlockSpec((1, hidden), lambda i: (0, 0)),             # b1
            pl.BlockSpec((hidden, n_p), lambda i: (0, 0)),           # W2
            pl.BlockSpec((1, n_p), lambda i: (0, 0)),                # b2
        ],
        out_specs=pl.BlockSpec((tb, n_p), lambda i: (i, 0)),
        compiler_params=pltpu.CompilerParams(
            dimension_semantics=("parallel",),
            vmem_limit_bytes=32 << 20,
        ),
    )(x, w1, b1_2d, w2_p, b2_2d)

    # Strip batch + lane padding.  (Consumers that can take the padded
    # (b_p, 128) slab could fuse/skip this slice.)
    return out[:B, :out_size]


def net_forward(x_nchw, w1, b1, w2, b2, *, batch_tile=None, min_grid=None):
    """x_nchw: (B, 1, 28, 28) f32.  w1: (784, 128), b1: (128,),
    w2: (128, output_size), b2: (output_size,)  (weights stored as (in, out),
    i.e. transposed vs. torch's (out, in)).  Returns (B, output_size) f32."""
    if batch_tile is None or min_grid is None:
        dbt, dmg = _device_defaults()
        batch_tile = dbt if batch_tile is None else batch_tile
        min_grid = dmg if min_grid is None else min_grid
    return _net_forward_impl(x_nchw, w1, b1, w2, b2,
                             batch_tile=batch_tile, min_grid=min_grid)


def init_params(key, in_features=28 * 28, hidden=128, output_size=10):
    """Deterministic init mimicking torch.nn.Linear default (uniform +/- 1/sqrt(fan_in))."""
    k1, k2, k3, k4 = jax.random.split(key, 4)
    bound1 = 1.0 / np.sqrt(in_features)
    bound2 = 1.0 / np.sqrt(hidden)
    # Stored as (in, out) so the kernel does x @ W (== torch's x @ W.T).
    w1 = jax.random.uniform(k1, (in_features, hidden), jnp.float32, -bound1, bound1)
    b1 = jax.random.uniform(k2, (hidden,), jnp.float32, -bound1, bound1)
    w2 = jax.random.uniform(k3, (hidden, output_size), jnp.float32, -bound2, bound2)
    b2 = jax.random.uniform(k4, (output_size,), jnp.float32, -bound2, bound2)
    return w1, b1, w2, b2


if __name__ == "__main__":
    key = jax.random.PRNGKey(0)
    k_x, k_p = jax.random.split(key)

    B, output_size = 8, 10
    # MNIST-shaped input, NCHW like PyTorch.
    x = jax.random.normal(k_x, (B, 1, 28, 28), jnp.float32)
    w1, b1, w2, b2 = init_params(k_p, output_size=output_size)

    out = net_forward(x, w1, b1, w2, b2)
    out = jax.block_until_ready(out)
    assert out.shape == (B, output_size)

    # Reference check: emulate the kernel's bf16-in / f32-accumulate math.
    x_flat = x.reshape(B, -1)
    h_ref = jnp.maximum(
        jnp.dot(x_flat.astype(jnp.bfloat16), w1.astype(jnp.bfloat16),
                preferred_element_type=jnp.float32) + b1, 0.0)
    ref = jnp.dot(h_ref.astype(jnp.bfloat16), w2.astype(jnp.bfloat16),
                  preferred_element_type=jnp.float32) + b2
    np.testing.assert_allclose(np.asarray(out), np.asarray(ref), rtol=2e-2, atol=2e-2)

    # Loose semantic check against the pure-f32 PyTorch forward.
    ref_f32 = jnp.maximum(x_flat @ w1 + b1, 0.0) @ w2 + b2
    np.testing.assert_allclose(np.asarray(out), np.asarray(ref_f32), rtol=5e-2, atol=5e-2)

    print("KERNEL_OK")
</pallas_src>

<mosaic_0001>
module attributes {stable_mosaic.version = 11 : i64} {
  func.func @mlp_kernel(%arg0: i32, %arg1: memref<8x784xf32, #tpu.memory_space<vmem>>, %arg2: memref<784x128xf32, #tpu.memory_space<vmem>>, %arg3: memref<1x128xf32, #tpu.memory_space<vmem>>, %arg4: memref<128x128xf32, #tpu.memory_space<vmem>>, %arg5: memref<1x128xf32, #tpu.memory_space<vmem>>, %arg6: memref<8x128xf32, #tpu.memory_space<vmem>>) attributes {dimension_semantics = [#tpu.dimension_semantics<parallel>], iteration_bounds = array<i64: 1>, scalar_prefetch = 0 : i64, scratch_operands = 0 : i64, tpu.core_type = #tpu.core_type<tc>, window_params = [{transform_indices = @transform_0, window_bounds = array<i64: 8, 784>}, {pipeline_mode = #tpu.pipeline_mode<synchronous>, transform_indices = @transform_1, window_bounds = array<i64: 784, 128>}, {pipeline_mode = #tpu.pipeline_mode<synchronous>, transform_indices = @transform_2, window_bounds = array<i64: 1, 128>}, {pipeline_mode = #tpu.pipeline_mode<synchronous>, transform_indices = @transform_3, window_bounds = array<i64: 128, 128>}, {pipeline_mode = #tpu.pipeline_mode<synchronous>, transform_indices = @transform_4, window_bounds = array<i64: 1, 128>}, {transform_indices = @transform_5, window_bounds = array<i64: 8, 128>}]} {
    %c0 = arith.constant 0 : index
    %c0_0 = arith.constant 0 : index
    %0 = vector.load %arg1[%c0, %c0_0] : memref<8x784xf32, #tpu.memory_space<vmem>>, vector<8x784xf32>
    %1 = arith.truncf %0 : vector<8x784xf32> to vector<8x784xbf16>
    %c0_1 = arith.constant 0 : index
    %c0_2 = arith.constant 0 : index
    %2 = vector.load %arg2[%c0_1, %c0_2] : memref<784x128xf32, #tpu.memory_space<vmem>>, vector<784x128xf32>
    %3 = arith.truncf %2 : vector<784x128xf32> to vector<784x128xbf16>
    %cst = arith.constant dense<0.000000e+00> : vector<8x128xf32>
    %4 = tpu.matmul %1, %3, %cst {dimension_numbers = #tpu.dot_dimension_numbers<[1], [0], [0], [1], [0, 0, 1, 1], [], []>} : vector<8x784xbf16>, vector<784x128xbf16>, vector<8x128xf32> -> vector<8x128xf32>
    %c0_3 = arith.constant 0 : index
    %c0_4 = arith.constant 0 : index
    %5 = vector.load %arg3[%c0_3, %c0_4] : memref<1x128xf32, #tpu.memory_space<vmem>>, vector<1x128xf32>
    %6 = vector.broadcast %5 : vector<1x128xf32> to vector<8x128xf32>
    %7 = arith.addf %4, %6 : vector<8x128xf32>
    %cst_5 = arith.constant 0.000000e+00 : f32
    %8 = vector.broadcast %cst_5 : f32 to vector<8x128xf32>
    %9 = arith.maximumf %7, %8 : vector<8x128xf32>
    %10 = arith.truncf %9 : vector<8x128xf32> to vector<8x128xbf16>
    %c0_6 = arith.constant 0 : index
    %c0_7 = arith.constant 0 : index
    %11 = vector.load %arg4[%c0_6, %c0_7] : memref<128x128xf32, #tpu.memory_space<vmem>>, vector<128x128xf32>
    %12 = arith.truncf %11 : vector<128x128xf32> to vector<128x128xbf16>
    %cst_8 = arith.constant dense<0.000000e+00> : vector<8x128xf32>
    %13 = tpu.matmul %10, %12, %cst_8 {dimension_numbers = #tpu.dot_dimension_numbers<[1], [0], [0], [1], [0, 0, 1, 1], [], []>} : vector<8x128xbf16>, vector<128x128xbf16>, vector<8x128xf32> -> vector<8x128xf32>
    %c0_9 = arith.constant 0 : index
    %c0_10 = arith.constant 0 : index
    %14 = vector.load %arg5[%c0_9, %c0_10] : memref<1x128xf32, #tpu.memory_space<vmem>>, vector<1x128xf32>
    %15 = vector.broadcast %14 : vector<1x128xf32> to vector<8x128xf32>
    %16 = arith.addf %13, %15 : vector<8x128xf32>
    %c0_11 = arith.constant 0 : index
    %c0_12 = arith.constant 0 : index
    %17 = vector.load %arg6[%c0_11, %c0_12] : memref<8x128xf32, #tpu.memory_space<vmem>>, vector<8x128xf32>
    tpu.vector_store %arg6[%c0_11, %c0_12], %16 {strides = array<i32>} : memref<8x128xf32, #tpu.memory_space<vmem>>, vector<8x128xf32>,
    return
  }
  func.func @transform_0(%arg0: i32) -> (i32, i32) {
    %c0_i32 = arith.constant 0 : i32
    %c0_i32_0 = arith.constant 0 : i32
    return %arg0, %c0_i32 : i32, i32
  }
  func.func @transform_1(%arg0: i32) -> (i32, i32) {
    %c0_i32 = arith.constant 0 : i32
    %c0_i32_0 = arith.constant 0 : i32
    %c0_i32_1 = arith.constant 0 : i32
    return %c0_i32, %c0_i32_0 : i32, i32
  }
  func.func @transform_2(%arg0: i32) -> (i32, i32) {
    %c0_i32 = arith.constant 0 : i32
    %c0_i32_0 = arith.constant 0 : i32
    %c0_i32_1 = arith.constant 0 : i32
    return %c0_i32, %c0_i32_0 : i32, i32
  }
  func.func @transform_3(%arg0: i32) -> (i32, i32) {
    %c0_i32 = arith.constant 0 : i32
    %c0_i32_0 = arith.constant 0 : i32
    %c0_i32_1 = arith.constant 0 : i32
    return %c0_i32, %c0_i32_0 : i32, i32
  }
  func.func @transform_4(%arg0: i32) -> (i32, i32) {
    %c0_i32 = arith.constant 0 : i32
    %c0_i32_0 = arith.constant 0 : i32
    %c0_i32_1 = arith.constant 0 : i32
    return %c0_i32, %c0_i32_0 : i32, i32
  }
  func.func @transform_5(%arg0: i32) -> (i32, i32) {
    %c0_i32 = arith.constant 0 : i32
    %c0_i32_0 = arith.constant 0 : i32
    return %arg0, %c0_i32 : i32, i32
  }
}

</mosaic_0001>

<bundles_post_ra>
// kernel: _net_forward_impl.1
= control target key start
LH: loop header
LB: loop body
LE: loop exit
PB: predicated region body
PF: predicated region fallthrough
CT: control target
= control target key end

     0   :  { %s1002_s0 = inlined_call_operand.vmem [shape: f32[8,784], index: 0, kind: input, shape index: {}]   ;;  %s1003_s1 = inlined_call_operand.vmem [shape: f32[784,128], index: 1, kind: input, shape index: {}]   ;;  %s1004_s2 = inlined_call_operand.vmem [shape: f32[1,128], index: 2, kind: input, shape index: {}]   ;;  %s1005_s3 = inlined_call_operand.vmem [shape: f32[128,128], index: 3, kind: input, shape index: {}]   ;;  %s1006_s4 = inlined_call_operand.vmem [shape: f32[1,128], index: 4, kind: input, shape index: {}]   ;;  %s1007_s5 = inlined_call_operand.hbm [shape: f32[8,128], index: 5, kind: output, shape index: {}]  }
   0x1   :  { %v52_v0 = vld [vmem:[%s1003_s1 + $0x80] sm:$0xff]  ;;  %v53_v1 = vld [vmem:[%s1003_s1 + $0x88] sm:$0xff]  ;;  %v54_v11 = vld [vmem:[%s1003_s1 + $0x90] sm:$0xff] }
   0x2   :  { %v36_v2 = vld [vmem:[%s1003_s1] sm:$0xff]  ;;  %v142_v3 = vpack.c.bf16 %v53_v1, %v52_v0  ;;  %v37_v4 = vld [vmem:[%s1003_s1 + $0x8] sm:$0xff]  ;;  %v55_v13 = vld [vmem:[%s1003_s1 + $0x98] sm:$0xff] }
   0x3   :  { %v84_v5 = vld [vmem:[%s1003_s1 + $0x180] sm:$0xff]  ;;  %v85_v6 = vld [vmem:[%s1003_s1 + $0x188] sm:$0xff]  ;;  %v134_v7 = vpack.c.bf16 %v37_v4, %v36_v2  ;;  %v38_v14 = vld [vmem:[%s1003_s1 + $0x10] sm:$0xff]  ;;  %v143_v16 = vpack.c.bf16 %v55_v13, %v54_v11 }
   0x4   :  { %v158_v8 = vpack.c.bf16 %v85_v6, %v84_v5  ;;  %v68_v9 = vld [vmem:[%s1003_s1 + $0x100] sm:$0xff]  ;;  %v69_v10 = vld [vmem:[%s1003_s1 + $0x108] sm:$0xff]  ;;  %445 = vmatprep.subr.bf16.mxu0 %v142_v3  ;;  %v39_v15 = vld [vmem:[%s1003_s1 + $0x18] sm:$0xff] }
   0x5   :  { %v150_v12 = vpack.c.bf16 %v69_v10, %v68_v9  ;;  %446 = vmatpush3.bf16.msra.mxu0 %v134_v7  ;;  %v135_v17 = vpack.c.bf16 %v39_v15, %v38_v14  ;;  %v86_v18 = vld [vmem:[%s1003_s1 + $0x190] sm:$0xff]  ;;  %v87_v19 = vld [vmem:[%s1003_s1 + $0x198] sm:$0xff]  ;;  %v56_v23 = vld [vmem:[%s1003_s1 + $0xa0] sm:$0xff] }
   0x6   :  { %467 = vmatprep.subr.bf16.mxu1 %v158_v8  ;;  %v70_v20 = vld [vmem:[%s1003_s1 + $0x110] sm:$0xff]  ;;  %v159_v21 = vpack.c.bf16 %v87_v19, %v86_v18  ;;  %v71_v22 = vld [vmem:[%s1003_s1 + $0x118] sm:$0xff]  ;;  %v57_v24 = vld [vmem:[%s1003_s1 + $0xa8] sm:$0xff]  ;;  %447 = vmatprep.subr.bf16.mxu0 %v143_v16 }
   0x7   :  { %468 = vmatpush3.bf16.msra.mxu1 %v150_v12  ;;  %v151_v25 = vpack.c.bf16 %v71_v22, %v70_v20  ;;  %v144_v26 = vpack.c.bf16 %v57_v24, %v56_v23  ;;  %v40_v27 = vld [vmem:[%s1003_s1 + $0x20] sm:$0xff]  ;;  %v41_v28 = vld [vmem:[%s1003_s1 + $0x28] sm:$0xff]  ;;  %v58_v35 = vld [vmem:[%s1003_s1 + $0xb0] sm:$0xff] }
   0x8   :  { %v88_v29 = vld [vmem:[%s1003_s1 + $0x1a0] sm:$0xff]  ;;  %469 = vmatprep.subr.bf16.mxu1 %v159_v21  ;;  %v89_v30 = vld [vmem:[%s1003_s1 + $0x1a8] sm:$0xff]  ;;  %v136_v33 = vpack.c.bf16 %v41_v28, %v40_v27  ;;  %v59_v36 = vld [vmem:[%s1003_s1 + $0xb8] sm:$0xff] }
   0x9   :  { %v72_v31 = vld [vmem:[%s1003_s1 + $0x120] sm:$0xff]  ;;  %v73_v32 = vld [vmem:[%s1003_s1 + $0x128] sm:$0xff]  ;;  %448 = vmatpush3.bf16.msra.mxu0 %v135_v17  ;;  %v160_v34 = vpack.c.bf16 %v89_v30, %v88_v29  ;;  %v42_v37 = vld [vmem:[%s1003_s1 + $0x30] sm:$0xff]  ;;  %v145_v39 = vpack.c.bf16 %v59_v36, %v58_v35 }
   0xa   :  { %449 = vmatprep.subr.bf16.mxu0 %v144_v26  ;;  %v152_v38 = vpack.c.bf16 %v73_v32, %v72_v31  ;;  %v43_v40 = vld [vmem:[%s1003_s1 + $0x38] sm:$0xff]  ;;  %v90_v41 = vld [vmem:[%s1003_s1 + $0x1b0] sm:$0xff]  ;;  %v60_v46 = vld [vmem:[%s1003_s1 + $0xc0] sm:$0xff] }
   0xb   :  { %470 = vmatpush3.bf16.msra.mxu1 %v151_v25  ;;  %v91_v42 = vld [vmem:[%s1003_s1 + $0x1b8] sm:$0xff]  ;;  %v74_v44 = vld [vmem:[%s1003_s1 + $0x130] sm:$0xff]  ;;  %v61_v47 = vld [vmem:[%s1003_s1 + $0xc8] sm:$0xff]  ;;  %v137_v48 = vpack.c.bf16 %v43_v40, %v42_v37 }
   0xc   :  { %471 = vmatprep.subr.bf16.mxu1 %v160_v34  ;;  %v161_v43 = vpack.c.bf16 %v91_v42, %v90_v41  ;;  %v75_v45 = vld [vmem:[%s1003_s1 + $0x138] sm:$0xff]  ;;  %v92_v49 = vld [vmem:[%s1003_s1 + $0x1c0] sm:$0xff]  ;;  %v93_v50 = vld [vmem:[%s1003_s1 + $0x1c8] sm:$0xff]  ;;  %v146_v52 = vpack.c.bf16 %v61_v47, %v60_v46 }
   0xd   :  { %450 = vmatpush3.bf16.msra.mxu0 %v136_v33  ;;  %v153_v51 = vpack.c.bf16 %v75_v45, %v74_v44  ;;  %v44_v53 = vld [vmem:[%s1003_s1 + $0x40] sm:$0xff]  ;;  %v45_v54 = vld [vmem:[%s1003_s1 + $0x48] sm:$0xff]  ;;  %v162_v56 = vpack.c.bf16 %v93_v50, %v92_v49  ;;  %v62_v58 = vld [vmem:[%s1003_s1 + $0xd0] sm:$0xff] }
   0xe   :  { %451 = vmatprep.subr.bf16.mxu0 %v145_v39  ;;  %v76_v55 = vld [vmem:[%s1003_s1 + $0x140] sm:$0xff]  ;;  %v77_v57 = vld [vmem:[%s1003_s1 + $0x148] sm:$0xff]  ;;  %v63_v59 = vld [vmem:[%s1003_s1 + $0xd8] sm:$0xff]  ;;  %v138_v62 = vpack.c.bf16 %v45_v54, %v44_v53 }
   0xf   :  { %472 = vmatpush3.bf16.msra.mxu1 %v152_v38  ;;  %v94_v60 = vld [vmem:[%s1003_s1 + $0x1d0] sm:$0xff]  ;;  %v95_v61 = vld [vmem:[%s1003_s1 + $0x1d8] sm:$0xff]  ;;  %v154_v63 = vpack.c.bf16 %v77_v57, %v76_v55  ;;  %v147_v0 = vpack.c.bf16 %v63_v59, %v62_v58  ;;  %v64_v6 = vld [vmem:[%s1003_s1 + $0xe0] sm:$0xff]  ;;  %v575_v55 = vmov 0.0  }
  0x10   :  { %473 = vmatprep.subr.bf16.mxu1 %v161_v43  ;;  %v46_v1 = vld [vmem:[%s1003_s1 + $0x50] sm:$0xff]  ;;  %v47_v2 = vld [vmem:[%s1003_s1 + $0x58] sm:$0xff]  ;;  %v163_v4 = vpack.c.bf16 %v95_v61, %v94_v60  ;;  %v65_v7 = vld [vmem:[%s1003_s1 + $0xe8] sm:$0xff] }
  0x11   :  { %452 = vmatpush3.bf16.msra.mxu0 %v137_v48  ;;  %v78_v3 = vld [vmem:[%s1003_s1 + $0x150] sm:$0xff]  ;;  %v79_v5 = vld [vmem:[%s1003_s1 + $0x158] sm:$0xff]  ;;  %v96_v8 = vld [vmem:[%s1003_s1 + $0x1e0] sm:$0xff]  ;;  %v139_v10 = vpack.c.bf16 %v47_v2, %v46_v1  ;;  %v148_v14 = vpack.c.bf16 %v65_v7, %v64_v6 }
  0x12   :  { %453 = vmatprep.subr.bf16.mxu0 %v146_v52  ;;  %v97_v9 = vld [vmem:[%s1003_s1 + $0x1e8] sm:$0xff]  ;;  %v48_v11 = vld [vmem:[%s1003_s1 + $0x60] sm:$0xff]  ;;  %v155_v13 = vpack.c.bf16 %v79_v5, %v78_v3  ;;  %v66_v20 = vld [vmem:[%s1003_s1 + $0xf0] sm:$0xff] }
  0x13   :  { %474 = vmatpush3.bf16.msra.mxu1 %v153_v51  ;;  %v23_v12 = vld [vmem:[%s1002_s0 + $0x8] sm:$0xff]  ;;  %v80_v16 = vld [vmem:[%s1003_s1 + $0x160] sm:$0xff]  ;;  %v164_v19 = vpack.c.bf16 %v97_v9, %v96_v8  ;;  %v67_v21 = vld [vmem:[%s1003_s1 + $0xf8] sm:$0xff] }
  0x14   :  { %475 = vmatprep.subr.bf16.mxu1 %v162_v56  ;;  %v49_v15 = vld [vmem:[%s1003_s1 + $0x68] sm:$0xff]  ;;  %v30_v18 = vpack.c.bf16 %v23_v12, %v23_v12  ;;  %v25_v22 = vld [vmem:[%s1002_s0 + $0x18] sm:$0xff]  ;;  %v98_v23 = vld [vmem:[%s1003_s1 + $0x1f0] sm:$0xff]  ;;  %v149_v28 = vpack.c.bf16 %v67_v21, %v66_v20 }
  0x15   :  { %454 = vmatpush3.bf16.msra.mxu0 %v138_v62  ;;  %v81_v17 = vld [vmem:[%s1003_s1 + $0x168] sm:$0xff]  ;;  %v99_v24 = vld [vmem:[%s1003_s1 + $0x1f8] sm:$0xff]  ;;  %v32_v25 = vpack.c.bf16 %v25_v22, %v25_v22  ;;  %v140_v26 = vpack.c.bf16 %v49_v15, %v48_v11  ;;  %v50_v29 = vld [vmem:[%s1003_s1 + $0x70] sm:$0xff] }
  0x16   :  { %455 = vmatprep.subr.bf16.mxu0 %v147_v0  ;;  %226 = vmatprep.mubr.bf16.mxu0 %v30_v18  ;;  %v156_v27 = vpack.c.bf16 %v81_v17, %v80_v16  ;;  %v51_v30 = vld [vmem:[%s1003_s1 + $0x78] sm:$0xff]  ;;  %v82_v31 = vld [vmem:[%s1003_s1 + $0x170] sm:$0xff]  ;;  %v165_v32 = vpack.c.bf16 %v99_v24, %v98_v23  ;;  %v116_v34 = vld [vmem:[%s1003_s1 + $0x280] sm:$0xff] }
  0x17   :  { %476 = vmatpush3.bf16.msra.mxu1 %v154_v63  ;;  %v83_v33 = vld [vmem:[%s1003_s1 + $0x178] sm:$0xff]  ;;  %v117_v35 = vld [vmem:[%s1003_s1 + $0x288] sm:$0xff]  ;;  %266 = vmatprep.mubr.bf16.mxu1 %v32_v25  ;;  %v141_v36 = vpack.c.bf16 %v51_v30, %v50_v29  ;;  %v22_v37 = vld [vmem:[%s1002_s0] sm:$0xff] }
  0x18   :  { %477 = vmatprep.subr.bf16.mxu1 %v163_v4  ;;  %v157_v38 = vpack.c.bf16 %v83_v33, %v82_v31  ;;  %v174_v39 = vpack.c.bf16 %v117_v35, %v116_v34  ;;  %v100_v40 = vld [vmem:[%s1003_s1 + $0x200] sm:$0xff]  ;;  %v101_v41 = vld [vmem:[%s1003_s1 + $0x208] sm:$0xff]  ;;  %v24_v42 = vld [vmem:[%s1002_s0 + $0x10] sm:$0xff]  ;;  %v29_v45 = vpack.c.bf16 %v22_v37, %v22_v37 }
  0x19   :  { %456 = vmatpush3.bf16.msra.mxu0 %v139_v10  ;;  %v118_v43 = vld [vmem:[%s1003_s1 + $0x290] sm:$0xff]  ;;  %v119_v44 = vld [vmem:[%s1003_s1 + $0x298] sm:$0xff]  ;;  %v166_v46 = vpack.c.bf16 %v101_v41, %v100_v40  ;;  %v31_v47 = vpack.c.bf16 %v24_v42, %v24_v42  ;;  %v132_v51 = vld [vmem:[%s1003_s1 + $0x300] sm:$0xff] }
  0x1a   :  { %457 = vmatprep.subr.bf16.mxu0 %v148_v14  ;;  %v102_v48 = vld [vmem:[%s1003_s1 + $0x210] sm:$0xff]  ;;  %v175_v49 = vpack.c.bf16 %v119_v44, %v118_v43  ;;  %v103_v50 = vld [vmem:[%s1003_s1 + $0x218] sm:$0xff]  ;;  %v133_v52 = vld [vmem:[%s1003_s1 + $0x308] sm:$0xff] }
  0x1b   :  { %478 = vmatpush3.bf16.msra.mxu1 %v155_v13  ;;  %v120_v53 = vld [vmem:[%s1003_s1 + $0x2a0] sm:$0xff]  ;;  %v121_v54 = vld [vmem:[%s1003_s1 + $0x2a8] sm:$0xff]  ;;  %v182_v56 = vpack.c.bf16 %v133_v52, %v132_v51 }
  0x1c   :  { %479 = vmatprep.subr.bf16.mxu1 %v164_v19  ;;  %v27_v57 = vld [vmem:[%s1002_s0 + $0x28] sm:$0xff] }
  0x1d   :  { %458 = vmatpush3.bf16.msra.mxu0 %v140_v26  ;;  %v34_v58 = vpack.c.bf16 %v27_v57, %v27_v57 }
  0x1e   :  { %459 = vmatprep.subr.bf16.mxu0 %v149_v28 }
  0x1f   :  { %480 = vmatpush3.bf16.msra.mxu1 %v156_v27 }
  0x20   :  { %481 = vmatprep.subr.bf16.mxu1 %v165_v32 }
  0x21   :  { %460 = vmatpush3.bf16.msra.mxu0 %v141_v36 }
  0x22   :  { %489 = vmatprep.subr.bf16.mxu0 %v174_v39 }
  0x23   :  { %482 = vmatpush3.bf16.msra.mxu1 %v157_v38 }
  0x24   :  { %522 = vmatprep.subr.bf16.mxu1 %v575_v55  ;;  %227 = vmatmul.mubr.bf16.vlgmr.msra.gmra.mrb[0].mxu0 %v29_v45 }
  0x25   :  { %10 = vsyncpa [#allocation3], 0  ;;  %490 = vmatpush3.bf16.msra.mxu0 %v166_v46  ;;  %v167_v59 = vpack.c.bf16 %v103_v50, %v102_v48  ;;  %v176_v60 = vpack.c.bf16 %v121_v54, %v120_v53  ;;  %v104_v61 = vld [vmem:[%s1003_s1 + $0x220] sm:$0xff]  ;;  %v105_v62 = vld [vmem:[%s1003_s1 + $0x228] sm:$0xff]  ;;  %306 = vmatprep.mubr.bf16.mxu0 %v34_v58  ;;  %vm576_vm0 = vmmov 0   ;;  %vm190_vm1 = vcmask 130048  }
  0x26   :  { %267 = vmatmul.mubr.bf16.vlgmr.msra.gmra.mrb[0].mxu1 %v31_v47  ;;  %491 = vmatprep.subr.bf16.mxu0 %v175_v49  ;;  %v28_v63 = vld [vmem:[%s1002_s0 + $0x30] sm:$0xff]  ;;  %v123_v1 = vld [vmem:[%s1003_s1 + $0x2b8] sm:$0xff]  ;;  %v168_v2 = vpack.c.bf16 %v105_v62, %v104_v61  ;;  %v124_v7 = vld [vmem:[%s1003_s1 + $0x2c0] sm:$0xff]  ;;  %s577_s9 = smov [#allocation2]  }
  0x27   :  { %523 = vmatpush3.bf16.msra.mxu1 %v182_v56  ;;  %v122_v0 = vld [vmem:[%s1003_s1 + $0x2b0] sm:$0xff]  ;;  %524 = vmatprep.mubr.msk.bf16.mxu1 %vm576_vm0, %v575_v55  ;;  %v35_v3 = vpack.c.bf16 %v28_v63, %v28_v63  ;;  %v107_v6 = vld [vmem:[%s1003_s1 + $0x238] sm:$0xff]  ;;  %v125_v8 = vld [vmem:[%s1003_s1 + $0x2c8] sm:$0xff] }
  0x28   :  { %528 = vmatprep.subr.bf16.mxu1 %v575_v55  ;;  %v177_v4 = vpack.c.bf16 %v123_v1, %v122_v0  ;;  %v106_v5 = vld [vmem:[%s1003_s1 + $0x230] sm:$0xff]  ;;  %v178_v10 = vpack.c.bf16 %v125_v8, %v124_v7  ;;  %v108_v11 = vld [vmem:[%s1003_s1 + $0x240] sm:$0xff]  ;;  %v109_v12 = vld [vmem:[%s1003_s1 + $0x248] sm:$0xff] }
  0x29   :  { %492 = vmatpush3.bf16.msra.mxu0 %v167_v59  ;;  %v169_v9 = vpack.c.bf16 %v107_v6, %v106_v5  ;;  %v126_v13 = vld [vmem:[%s1003_s1 + $0x2d0] sm:$0xff]  ;;  %v127_v14 = vld [vmem:[%s1003_s1 + $0x2d8] sm:$0xff]  ;;  %v170_v15 = vpack.c.bf16 %v109_v12, %v108_v11  ;;  %v128_v19 = vld [vmem:[%s1003_s1 + $0x2e0] sm:$0xff] }
  0x2a   :  { %493 = vmatprep.subr.bf16.mxu0 %v176_v60  ;;  %v179_v16 = vpack.c.bf16 %v127_v14, %v126_v13  ;;  %v110_v17 = vld [vmem:[%s1003_s1 + $0x250] sm:$0xff]  ;;  %v111_v18 = vld [vmem:[%s1003_s1 + $0x258] sm:$0xff]  ;;  %v129_v20 = vld [vmem:[%s1003_s1 + $0x2e8] sm:$0xff] }
  0x2b   :  { %v171_v21 = vpack.c.bf16 %v111_v18, %v110_v17  ;;  %v180_v22 = vpack.c.bf16 %v129_v20, %v128_v19  ;;  %v112_v23 = vld [vmem:[%s1003_s1 + $0x260] sm:$0xff]  ;;  %v113_v24 = vld [vmem:[%s1003_s1 + $0x268] sm:$0xff]  ;;  %v130_v25 = vld [vmem:[%s1003_s1 + $0x2f0] sm:$0xff] }
  0x2c   :  { %v131_v26 = vld [vmem:[%s1003_s1 + $0x2f8] sm:$0xff]  ;;  %v172_v27 = vpack.c.bf16 %v113_v24, %v112_v23  ;;  %v114_v29 = vld [vmem:[%s1003_s1 + $0x270] sm:$0xff]  ;;  %v26_v32 = vld [vmem:[%s1002_s0 + $0x20] sm:$0xff]  ;;  %s434_s0 = sshll.u32 %s577_s9, 4  ;;  %s435_s0 = int_to_ptr.vmem [resolvable:$true] %s434_s0 }
  0x2d   :  { %494 = vmatpush3.bf16.msra.mxu0 %v168_v2  ;;  %v181_v28 = vpack.c.bf16 %v131_v26, %v130_v25  ;;  %v115_v30 = vld [vmem:[%s1003_s1 + $0x278] sm:$0xff]  ;;  %v33_v33 = vpack.c.bf16 %v26_v32, %v26_v32  ;;  %v356_v34 = vld [vmem:[%s1005_s3] sm:$0xff]  ;;  %v357_v35 = vld [vmem:[%s1005_s3 + $0x8] sm:$0xff]  ;;  %s551_s10 = scalar_lea.vmem %s435_s0, 128  ;;  %p556_p1 = scmp.lt.s32.totalorder %s435_s0, %s435_s0 }
  0x2e   :  { %525 = vmatmul.mubr.msk.bf16.vlgmr.msra.gmra.mrb[4].mxu1 %vm190_vm1, %v35_v3  ;;  %495 = vmatprep.subr.bf16.mxu0 %v177_v4  ;;  %v173_v31 = vpack.c.bf16 %v115_v30, %v114_v29  ;;  %v358_v36 = vld [vmem:[%s1005_s3 + $0x10] sm:$0xff]  ;;  %v372_v37 = vpack.c.bf16 %v357_v35, %v356_v34  ;;  %v359_v38 = vld [vmem:[%s1005_s3 + $0x18] sm:$0xff]  ;;  %v360_v40 = vld [vmem:[%s1005_s3 + $0x20] sm:$0xff]  ;;  %p552_p0 = scmp.ne.s32.totalorder %s435_s0, %s551_s10  ;;  %p557_p2 = scmp.lt.s32.totalorder %s551_s10, %s551_s10 }
  0x2f   :  { %544 = vmatprep.mubr.msk.bf16.mxu1 %vm576_vm0, %v575_v55  ;;  %v373_v39 = vpack.c.bf16 %v359_v38, %v358_v36  ;;  %v361_v41 = vld [vmem:[%s1005_s3 + $0x28] sm:$0xff]  ;;  %v362_v43 = vld [vmem:[%s1005_s3 + $0x30] sm:$0xff]  ;;  %v363_v44 = vld [vmem:[%s1005_s3 + $0x38] sm:$0xff] }
  0x30   :  { %529 = vmatpush3.bf16.msra.mxu1 %v372_v37  ;;  %v374_v42 = vpack.c.bf16 %v361_v41, %v360_v40  ;;  %v375_v45 = vpack.c.bf16 %v363_v44, %v362_v43  ;;  %v364_v46 = vld [vmem:[%s1005_s3 + $0x40] sm:$0xff]  ;;  %v365_v47 = vld [vmem:[%s1005_s3 + $0x48] sm:$0xff]  ;;  %v366_v49 = vld [vmem:[%s1005_s3 + $0x50] sm:$0xff]  ;;  %p558_p3 = por %p557_p2, %p556_p1 }
  0x31   :  { %496 = vmatpush3.bf16.msra.mxu0 %v169_v9  ;;  %530 = vmatprep.subr.bf16.mxu1 %v575_v55  ;;  %v376_v48 = vpack.c.bf16 %v365_v47, %v364_v46  ;;  %v367_v50 = vld [vmem:[%s1005_s3 + $0x58] sm:$0xff]  ;;  %v368_v52 = vld [vmem:[%s1005_s3 + $0x60] sm:$0xff]  ;;  %v369_v53 = vld [vmem:[%s1005_s3 + $0x68] sm:$0xff] }
  0x32   :  { %497 = vmatprep.subr.bf16.mxu0 %v178_v10  ;;  %v377_v51 = vpack.c.bf16 %v367_v50, %v366_v49  ;;  %v378_v54 = vpack.c.bf16 %v369_v53, %v368_v52  ;;  %v370_v56 = vld [vmem:[%s1005_s3 + $0x70] sm:$0xff]  ;;  %v371_v57 = vld [vmem:[%s1005_s3 + $0x78] sm:$0xff]  ;;  %v442_v60 = vld [vmem:[%s1004_s2] ss:$0 sm:$0xff]  ;;  %p559_p4 = pnand %p558_p3, %p552_p0 }
  0x33   :  { %v379_v58 = vpack.c.bf16 %v371_v57, %v370_v56  ;;  %v444_v20 = vld [vmem:[%s1006_s4] ss:$0 sm:$0xff] }
  0x34   :  { %531 = vmatpush3.bf16.msra.mxu1 %v373_v39 }
  0x35   :  { %498 = vmatpush3.bf16.msra.mxu0 %v170_v15  ;;  %532 = vmatprep.subr.bf16.mxu1 %v575_v55 }
  0x36   :  { %499 = vmatprep.subr.bf16.mxu0 %v179_v16 }
  0x38   :  { %533 = vmatpush3.bf16.msra.mxu1 %v374_v42 }
  0x39   :  { %500 = vmatpush3.bf16.msra.mxu0 %v171_v21  ;;  %534 = vmatprep.subr.bf16.mxu1 %v575_v55 }
  0x3a   :  { %501 = vmatprep.subr.bf16.mxu0 %v180_v22 }
  0x3c   :  { %535 = vmatpush3.bf16.msra.mxu1 %v375_v45 }
  0x3d   :  { %502 = vmatpush3.bf16.msra.mxu0 %v172_v27  ;;  %536 = vmatprep.subr.bf16.mxu1 %v575_v55 }
  0x3e   :  { %503 = vmatprep.subr.bf16.mxu0 %v181_v28 }
  0x40   :  { %537 = vmatpush3.bf16.msra.mxu1 %v376_v48 }
  0x41   :  { %504 = vmatpush3.bf16.msra.mxu0 %v173_v31  ;;  %538 = vmatprep.subr.bf16.mxu1 %v575_v55 }
  0x44   :  { %307 = vmatmul.mubr.bf16.vlgmr.msra.gmra.mrb[4].mxu0 %v33_v33  ;;  %539 = vmatpush3.bf16.msra.mxu1 %v377_v51 }
  0x45   :  { %540 = vmatprep.subr.bf16.mxu1 %v575_v55 }
  0x48   :  { %541 = vmatpush3.bf16.msra.mxu1 %v378_v54 }
  0x49   :  { %542 = vmatprep.subr.bf16.mxu1 %v575_v55 }
  0x4c   :  { %543 = vmatpush3.bf16.msra.mxu1 %v379_v58 }
  0xf7   :  { %v461_v59 = vpop.f32.mrb[0].mxu0 }
  0xf8   :  { %v462_v61 = vpop.f32.mrb[1].mxu0 }
  0xf9   :  { %v483_v62 = vpop.f32.mrb[0].mxu1  ;;  %v463_v63 = vadd.f32 %v462_v61, %v461_v59  ;;  %v464_v0 = vpop.f32.mrb[2].mxu0 }
  0xfa   :  { %v484_v55 = vpop.f32.mrb[1].mxu1  ;;  %v465_v1 = vpop.f32.mrb[3].mxu0 }
  0xfb   :  { %v485_v2 = vadd.f32 %v484_v55, %v483_v62  ;;  %v486_v3 = vpop.f32.mrb[2].mxu1  ;;  %v229_v4 = vadd.f32 %v463_v63, %v442_v60 }
  0xfc   :  { %v487_v5 = vpop.f32.mrb[3].mxu1 }
  0xfd   :  { %v269_v6 = vadd.f32 %v485_v2, %v229_v4 }
 0x101   :  { %v348_v7 = vpop.f32.mrb[4].mxu1 }
 0x102   :  { %v526_v8 = vpop.f32.mrb[5].mxu1 }
 0x103   :  { %v351_v9 = vpop.f32.mrb[6].mxu1 }
 0x104   :  { %v527_v10 = vpop.f32.mrb[7].mxu1 }
 0x117   :  { %v505_v11 = vpop.f32.mrb[4].mxu0 }
 0x118   :  { %v506_v12 = vpop.f32.mrb[5].mxu0 }
 0x119   :  { %v507_v13 = vadd.f32 %v506_v12, %v505_v11  ;;  %v508_v14 = vpop.f32.mrb[6].mxu0 }
 0x11a   :  { %v509_v15 = vpop.f32.mrb[7].mxu0 }
 0x11b   :  { %v309_v16 = vadd.f32 %v507_v13, %v269_v6 }
 0x11d   :  { %v349_v17 = vadd.f32 %v348_v7, %v309_v16 }
 0x11f   :  { %v354_v18 = vmax.f32 %v349_v17, 0.0 }
 0x121   :  { %v355_v19 = vpack.c.bf16 %v354_v18, %v354_v18 }
 0x123   :  { %545 = vmatmul.mubr.bf16.vlgmr.msra.gmra.mrb[8].mxu1 %v355_v19 }
 0x1f6   :  { %v421_v21 = vpop.f32.mrb[8].mxu1 }
 0x1f7   :  { %v422_v22 = vadd.f32 %v444_v20, %v421_v21  ;;  %v546_v23 = vpop.f32.mrb[9].mxu1 }
 0x1f8   :  { %v424_v24 = vpop.f32.mrb[10].mxu1 }
 0x1f9   :  { %427 = vst [vmem:[#allocation2] sm:$0xff] %v422_v22  ;;  %v547_v25 = vpop.f32.mrb[11].mxu1 }
 0x1fa   :  { %562 = shalt.err (!%p559_p4)
}
 0x1fb   :  { %s563_s4 = scalar_lea.hbm %s1007_s5, 128 }
 0x1fc   :  { %p564_p5 = scmp.ne.s32.totalorder %s1007_s5, %s563_s4  ;;  %p567_p6 = scmp.lt.u32.totalorder %s563_s4, %s1007_s5 }
 0x1fe   :  { %p569_p7 = pnand %p567_p6, %p564_p5 }
 0x200   :  { %572 = shalt.err (!%p569_p7)
}
 0x201   :  { %437 = dma.vmem_to_hbm [thread:$0]  %s435_s0, 128, %s1007_s5, [#allocation3]  }
 0x202   :  { %573 = dma.done.wait [#allocation3], 128  }
 0x203   :  { %574 = vsyncadd [#allocation3], 4294967168 }
 0x204   :  { %441 = vsyncpa [#allocation3], 1 }

</bundles_post_ra>
